<compile_context>
chip_gen: v5e
topology: v5e:2x2
jax: 0.10.0
libtpu: 0.0.40
codegen_flags: <defaults>
</compile_context>

<pallas_src>
import functools

import jax
import jax.numpy as jnp
from jax.experimental import pallas as pl
from jax.experimental.pallas import tpu as pltpu


def _apply_act(y, act, leaky_slope):
    if act is None or act == "identity":
        return y
    if act == "relu":
        return jnp.maximum(y, 0.0)
    if act == "relu6":
        return jnp.clip(y, 0.0, 6.0)
    if act == "leaky":
        return jnp.where(y >= 0.0, y, leaky_slope * y)
    raise Exception("Error")


def _ffl_kernel_fused(*refs, act, leaky_slope, use_bias):
    # 2-D grid: x (tm, K), w (K, tn), [b (1, tn)], out (tm, tn). No scratch.
    if use_bias:
        x_ref, w_ref, b_ref, o_ref = refs
    else:
        x_ref, w_ref, o_ref = refs
        b_ref = None

    y = jnp.dot(x_ref[...], w_ref[...], preferred_element_type=jnp.float32)
    if use_bias:
        y = y + b_ref[...].astype(jnp.float32)
    y = _apply_act(y, act, leaky_slope)
    o_ref[...] = y.astype(o_ref.dtype)


def _ffl_kernel_acc(*refs, act, leaky_slope, use_bias):
    # 3-D grid: x (tm, tk), w (tk, tn), [b (1, tn)], out (tm, tn), acc f32.
    if use_bias:
        x_ref, w_ref, b_ref, o_ref, acc_ref = refs
    else:
        x_ref, w_ref, o_ref, acc_ref = refs
        b_ref = None

    k = pl.program_id(2)

    @pl.when(k == 0)
    def _():
        acc_ref[...] = jnp.zeros_like(acc_ref)

    acc_ref[...] += jnp.dot(x_ref[...], w_ref[...],
                            preferred_element_type=jnp.float32)

    @pl.when(k == pl.num_programs(2) - 1)
    def _():
        y = acc_ref[...]
        if use_bias:
            y = y + b_ref[...].astype(jnp.float32)
        y = _apply_act(y, act, leaky_slope)
        o_ref[...] = y.astype(o_ref.dtype)


def prepare_linear_params(weight, bias=None):
    """Convert PyTorch nn.Linear params once (cache the result).

    weight: [out_feat, in_feat] -> returns W^T [in_feat, out_feat].
    """
    w_t = jnp.asarray(weight).T
    b2d = None if bias is None else jnp.asarray(bias).reshape(1, -1)
    return w_t, b2d


def _pick_mn_tile(dim, target):
    # Ragged last tiles are fine for M / N (OOB writes are dropped).
    return dim if dim <= target else target


def _pick_k_tile(dim, target):
    # K tiles must divide in_feat exactly (otherwise garbage from padded OOB
    # reads would be accumulated into valid outputs).  Fall back to full K.
    if dim <= target:
        return dim
    for cand in range(target, 127, -128):
        if dim % cand == 0:
            return cand
    return dim


def feed_forward_layer(embeds, weight_t, bias=None, act=None, leaky_slope=0.01,
                       *, tm=512, tn=256, tk=512):
    """Pallas equivalent of FeedForwardLayer.forward.

    embeds   : [..., in_feat]
    weight_t : [in_feat, out_feat]  (pre-transposed; see prepare_linear_params)
    bias     : [out_feat] / [1, out_feat] / None
    """
    orig_shape = embeds.shape
    in_feat = orig_shape[-1]
    out_feat = weight_t.shape[1]
    assert weight_t.shape[0] == in_feat

    x = embeds.reshape(-1, in_feat) if embeds.ndim != 2 else embeds
    N = x.shape[0]

    use_bias = bias is not None
    if use_bias:
        b2d = jnp.asarray(bias).reshape(1, out_feat)

    tm_t = _pick_mn_tile(N, max(8, (tm // 8) * 8))
    tn_t = _pick_mn_tile(out_feat, max(128, (tn // 128) * 128))
    tk_t = _pick_k_tile(in_feat, max(128, (tk // 128) * 128))

    gm = pl.cdiv(N, tm_t)
    gn = pl.cdiv(out_feat, tn_t)
    gk = pl.cdiv(in_feat, tk_t)
    fused = (gk == 1)

    x_bytes = x.dtype.itemsize
    w_bytes = weight_t.dtype.itemsize
    o_bytes = jnp.dtype(embeds.dtype).itemsize

    cost = pl.CostEstimate(
        flops=2 * N * in_feat * out_feat,
        transcendentals=0,
        bytes_accessed=(x.size * x_bytes
                        + weight_t.size * w_bytes
                        + (out_feat * x_bytes if use_bias else 0)
                        + N * out_feat * o_bytes))

    if fused:
        grid = (gm, gn)
        in_specs = [
            pl.BlockSpec((tm_t, tk_t), lambda i, j: (i, 0)),
            pl.BlockSpec((tk_t, tn_t), lambda i, j: (0, j)),
        ]
        operands = [x, weight_t]
        if use_bias:
            in_specs.append(pl.BlockSpec((1, tn_t), lambda i, j: (0, j)))
            operands.append(b2d)
        out_specs = pl.BlockSpec((tm_t, tn_t), lambda i, j: (i, j))
        scratch_shapes = []
        dim_sem = ("parallel", "parallel")
        kernel = functools.partial(_ffl_kernel_fused, act=act,
                                   leaky_slope=leaky_slope, use_bias=use_bias)
        acc_bytes = 0
    else:
        grid = (gm, gn, gk)
        in_specs = [
            pl.BlockSpec((tm_t, tk_t), lambda i, j, k: (i, k)),
            pl.BlockSpec((tk_t, tn_t), lambda i, j, k: (k, j)),
        ]
        operands = [x, weight_t]
        if use_bias:
            in_specs.append(pl.BlockSpec((1, tn_t), lambda i, j, k: (0, j)))
            operands.append(b2d)
        out_specs = pl.BlockSpec((tm_t, tn_t), lambda i, j, k: (i, j))
        scratch_shapes = [pltpu.VMEM((tm_t, tn_t), jnp.float32)]
        dim_sem = ("parallel", "parallel", "arbitrary")
        kernel = functools.partial(_ffl_kernel_acc, act=act,
                                   leaky_slope=leaky_slope, use_bias=use_bias)
        acc_bytes = tm_t * tn_t * 4

    # Double-buffered input/output tiles (+ f32 accumulator scratch if any).
    vmem_bytes = (2 * tm_t * tk_t * x_bytes
                  + 2 * tk_t * tn_t * w_bytes
                  + (2 * tn_t * x_bytes if use_bias else 0)
                  + 2 * tm_t * tn_t * o_bytes
                  + acc_bytes)
    vmem_limit = int(min(max(2 * vmem_bytes + (8 << 20), 32 << 20), 64 << 20))

    out = pl.pallas_call(
        kernel,
        out_shape=jax.ShapeDtypeStruct((N, out_feat), embeds.dtype),
        grid_spec=pltpu.PrefetchScalarGridSpec(
            num_scalar_prefetch=0,
            grid=grid,
            in_specs=in_specs,
            out_specs=out_specs,
            scratch_shapes=scratch_shapes,
        ),
        compiler_params=pltpu.CompilerParams(
            dimension_semantics=dim_sem,
            vmem_limit_bytes=vmem_limit),
        cost_estimate=cost,
    )(*operands)

    if embeds.ndim != 2:
        out = out.reshape(orig_shape[:-1] + (out_feat,))
    return out


if __name__ == "__main__":
    # ---- Small shapes consistent with the module (nodes x features) --------
    N, in_feat, out_feat = 8, 32, 16

    key = jax.random.PRNGKey(0)
    k_x, k_w, k_b = jax.random.split(key, 3)

    embeds = jax.random.normal(k_x, (N, in_feat), dtype=jnp.float32)
    bound = 1.0 / (in_feat ** 0.5)
    weight = jax.random.uniform(k_w, (out_feat, in_feat), jnp.float32,
                                -bound, bound)
    bias = jax.random.uniform(k_b, (out_feat,), jnp.float32, -bound, bound)

    # Hoisted, one-time param prep (the weight transpose is NOT per-call).
    w_t, b2d = prepare_linear_params(weight, bias)

    # ReLU path (fused 2-D grid: matmul + bias + act in one kernel step).
    out = jax.block_until_ready(feed_forward_layer(embeds, w_t, b2d, act="relu"))
    ref = jnp.maximum(
        jnp.matmul(embeds, weight.T, precision=jax.lax.Precision.HIGHEST) + bias,
        0.0)
    assert out.shape == (N, out_feat)
    assert jnp.allclose(out, ref, atol=1e-5, rtol=1e-5)

    # Identity, no-bias path (bias operand is dropped entirely).
    out_id = jax.block_until_ready(feed_forward_layer(embeds, w_t, None, act=None))
    ref_id = jnp.matmul(embeds, weight.T, precision=jax.lax.Precision.HIGHEST)
    assert jnp.allclose(out_id, ref_id, atol=1e-5, rtol=1e-5)

    # ReLU6 path.
    out_r6 = jax.block_until_ready(feed_forward_layer(embeds, w_t, b2d, act="relu6"))
    ref_r6 = jnp.clip(
        jnp.matmul(embeds, weight.T, precision=jax.lax.Precision.HIGHEST) + bias,
        0.0, 6.0)
    assert jnp.allclose(out_r6, ref_r6, atol=1e-5, rtol=1e-5)

    # Modest larger case: forces the 3-D K-reduction grid (tk=128 -> 2 K steps),
    # f32 accumulator, and ragged M / N edge tiles (no activation padding).
    N2, f_in2, f_out2 = 300, 256, 384
    k1, k2, k3 = jax.random.split(jax.random.PRNGKey(1), 3)
    x2 = jax.random.normal(k1, (N2, f_in2), jnp.float32)
    w2 = jax.random.uniform(k2, (f_out2, f_in2), jnp.float32, -0.05, 0.05)
    b2 = jax.random.uniform(k3, (f_out2,), jnp.float32, -0.05, 0.05)
    w2_t, b2_2d = prepare_linear_params(w2, b2)

    out2 = jax.block_until_ready(
        feed_forward_layer(x2, w2_t, b2_2d, act="leaky", leaky_slope=0.2,
                           tm=256, tn=256, tk=128))
    lin2 = jnp.matmul(x2, w2.T, precision=jax.lax.Precision.HIGHEST) + b2
    ref2 = jnp.where(lin2 >= 0.0, lin2, 0.2 * lin2)
    assert out2.shape == (N2, f_out2)
    assert jnp.allclose(out2, ref2, atol=1e-4, rtol=1e-4)

    print("KERNEL_OK")
</pallas_src>

<mosaic_0001>
module attributes {stable_mosaic.version = 11 : i64} {
  func.func @_ffl_kernel_fused(%arg0: i32, %arg1: i32, %arg2: memref<8x32xf32, #tpu.memory_space<vmem>>, %arg3: memref<32x16xf32, #tpu.memory_space<vmem>>, %arg4: memref<1x16xf32, #tpu.memory_space<vmem>>, %arg5: memref<8x16xf32, #tpu.memory_space<vmem>>) attributes {dimension_semantics = [#tpu.dimension_semantics<parallel>, #tpu.dimension_semantics<parallel>], iteration_bounds = array<i64: 1, 1>, scalar_prefetch = 0 : i64, scratch_operands = 0 : i64, tpu.core_type = #tpu.core_type<tc>, window_params = [{transform_indices = @transform_0, window_bounds = array<i64: 8, 32>}, {transform_indices = @transform_1, window_bounds = array<i64: 32, 16>}, {transform_indices = @transform_2, window_bounds = array<i64: 1, 16>}, {transform_indices = @transform_3, window_bounds = array<i64: 8, 16>}]} {
    %c0 = arith.constant 0 : index
    %c0_0 = arith.constant 0 : index
    %0 = vector.load %arg2[%c0, %c0_0] : memref<8x32xf32, #tpu.memory_space<vmem>>, vector<8x32xf32>
    %c0_1 = arith.constant 0 : index
    %c0_2 = arith.constant 0 : index
    %1 = vector.load %arg3[%c0_1, %c0_2] : memref<32x16xf32, #tpu.memory_space<vmem>>, vector<32x16xf32>
    %cst = arith.constant dense<0.000000e+00> : vector<8x16xf32>
    %2 = tpu.matmul %0, %1, %cst {dimension_numbers = #tpu.dot_dimension_numbers<[1], [0], [0], [1], [0, 0, 1, 1], [], []>} : vector<8x32xf32>, vector<32x16xf32>, vector<8x16xf32> -> vector<8x16xf32>
    %c0_3 = arith.constant 0 : index
    %c0_4 = arith.constant 0 : index
    %3 = vector.load %arg4[%c0_3, %c0_4] : memref<1x16xf32, #tpu.memory_space<vmem>>, vector<1x16xf32>
    %4 = vector.broadcast %3 : vector<1x16xf32> to vector<8x16xf32>
    %5 = arith.addf %2, %4 : vector<8x16xf32>
    %cst_5 = arith.constant 0.000000e+00 : f32
    %6 = vector.broadcast %cst_5 : f32 to vector<8x16xf32>
    %7 = arith.maximumf %5, %6 : vector<8x16xf32>
    %c0_6 = arith.constant 0 : index
    %c0_7 = arith.constant 0 : index
    %8 = vector.load %arg5[%c0_6, %c0_7] : memref<8x16xf32, #tpu.memory_space<vmem>>, vector<8x16xf32>
    tpu.vector_store %arg5[%c0_6, %c0_7], %7 {strides = array<i32>} : memref<8x16xf32, #tpu.memory_space<vmem>>, vector<8x16xf32>,
    return
  }
  func.func @transform_0(%arg0: i32, %arg1: i32) -> (i32, i32) {
    %c0_i32 = arith.constant 0 : i32
    %c0_i32_0 = arith.constant 0 : i32
    return %arg0, %c0_i32 : i32, i32
  }
  func.func @transform_1(%arg0: i32, %arg1: i32) -> (i32, i32) {
    %c0_i32 = arith.constant 0 : i32
    %c0_i32_0 = arith.constant 0 : i32
    return %c0_i32, %arg1 : i32, i32
  }
  func.func @transform_2(%arg0: i32, %arg1: i32) -> (i32, i32) {
    %c0_i32 = arith.constant 0 : i32
    %c0_i32_0 = arith.constant 0 : i32
    return %c0_i32, %arg1 : i32, i32
  }
  func.func @transform_3(%arg0: i32, %arg1: i32) -> (i32, i32) {
    %c0_i32 = arith.constant 0 : i32
    return %arg0, %arg1 : i32, i32
  }
}

</mosaic_0001>

<bundles_post_ra>
// kernel: tpu_custom_call.1
= control target key start
LH: loop header
LB: loop body
LE: loop exit
PB: predicated region body
PF: predicated region fallthrough
CT: control target
= control target key end

     0   :  { %s138_s0 = inlined_call_operand.vmem [shape: f32[8,32], index: 0, kind: input, shape index: {}]   ;;  %s139_s1 = inlined_call_operand.vmem [shape: f32[32,16], index: 1, kind: input, shape index: {}]   ;;  %s140_s2 = inlined_call_operand.vmem [shape: f32[1,16], index: 2, kind: input, shape index: {}]   ;;  %s141_s3 = inlined_call_operand.hbm [shape: f32[8,16], index: 3, kind: output, shape index: {}]  }
   0x1   :  { %v19_v0 = vld [vmem:[%s139_s1 + $0x18] sm:$0xff]  ;;  %v18_v1 = vld [vmem:[%s139_s1 + $0x10] sm:$0xff]  ;;  %v17_v2 = vld [vmem:[%s139_s1 + $0x8] sm:$0xff] }
   0x2   :  { %40 = vmatpush.msra.mxu0 %v19_v0 }
   0x3   :  { %8 = vsyncpa [#allocation3], 0  ;;  %v16_v3 = vld [vmem:[%s139_s1] sm:$0xff]  ;;  %vm24_vm0 = vcmask 261120   ;;  %s96_s24 = smov [#allocation2]   ;;  %s58_s28 = sshll.u32 %s141_s3, 4  ;;  %s59_s28 = int_to_ptr.hbm [resolvable:$true] %s58_s28 }
   0x4   :  { %41 = vmatpush.msra.mxu0 %v18_v1  ;;  %v15_v4 = vld [vmem:[%s138_s0] sm:$0xff]  ;;  %s56_s25 = sshll.u32 %s96_s24, 4  ;;  %vm49_vm1 = vcmask 130048   ;;  %s57_s25 = int_to_ptr.vmem [resolvable:$true] %s56_s25 }
   0x5   :  { %v69_v5 = vld [vmem:[%s140_s2] ss:$0 sm:$0xff] }
   0x6   :  { %42 = vmatpush.msra.mxu0 %v17_v2 }
   0x8   :  { %43 = vmatpush.msra.mxu0 %v16_v3 }
   0x9   :  { %67 = vmatmul.msk.f32.vlgmr.msra.gmra.mxu0 %vm24_vm0, %v15_v4 }
  0x86   :  { %v45_v6 = vpop.f32.mrf.mxu0 }
  0x87   :  { %v46_v7 = vadd.f32 %v69_v5, %v45_v6 }
  0x89   :  { %v48_v8 = vmax.f32 %v46_v7, 0.0 }
  0x8b   :  { %50 = vst.msk [vmem:[#allocation2] sm:$0xff] %vm49_vm1, %v48_v8 }
  0x8c   :  { %61 = dma.vmem_to_hbm [thread:$0]  %s57_s25, 128, %s59_s28, [#allocation3]  }
  0x8d   :  { %94 = dma.done.wait [#allocation3], 128  }
  0x8e   :  { %95 = vsyncadd [#allocation3], 4294967168 }
  0x8f   :  { %66 = vsyncpa [#allocation3], 1 }

</bundles_post_ra>
